<compile_context>
chip_gen: v6e
topology: v6e:2x2x1
jax: 0.10.0
libtpu: 0.0.40
codegen_flags: <defaults>
</compile_context>

<pallas_src>
import functools

import jax
import jax.numpy as jnp
import numpy as np
from jax.experimental import pallas as pl
from jax.experimental.pallas import tpu as pltpu


def _patch_embed_kernel(p_ref, w_ref, pos_ref, o_ref, *, tm, n_pos):
    # p_ref  : (tm, K)     bf16 patch rows for this M tile
    # w_ref  : (K,  E)     bf16 projection weight (VMEM-resident, loaded once)
    # pos_ref: (n_pos, E)  bf16 pos_embed (+ folded bias), VMEM-resident
    # o_ref  : (tm, E)     output tile (x.dtype)
    i = pl.program_id(0)
    # pos row offset for this tile; tm | n_pos so a tile never crosses a batch.
    n0 = pl.multiple_of((i * tm) % n_pos, tm)

    acc = jnp.dot(p_ref[...], w_ref[...], preferred_element_type=jnp.float32)
    pos = pos_ref[pl.ds(n0, tm), :].astype(jnp.float32)
    o_ref[...] = (acc + pos).astype(o_ref.dtype)


def _round_up(v, m):
    return ((v + m - 1) // m) * m


def _choose_tiling(B, N, K, E):
    """Pick the M-tile size tm (multiple of 16) and the padded patch count Np."""
    # Conservative per-step VMEM estimate (bytes); resident blocks counted with
    # double buffers to stay safe under the default scoped limits.
    def vmem_est(tm):
        return (2 * tm * K * 2        # patches tile (bf16, double-buffered)
                + 2 * K * E * 2       # resident weight (bf16)
                + 2 * N * E * 2       # resident pos table (bf16)
                + 2 * tm * E * 4)     # output tile (f32, double-buffered)

    budget = 24 * 1024 * 1024         # v7x-safe (64 MiB physical / 32 MiB scoped)

    max_tm = 512
    # Keep >= ~8 grid steps when possible: pipelining + feeds v7x's 2 TCs.
    while max_tm > 16 and (B * N) // max_tm < 8:
        max_tm //= 2
    while max_tm > 16 and vmem_est(max_tm) > budget:
        max_tm //= 2
    # TODO(synk): add K-tiled accumulator / E-tiled paths for configs where the
    # full (K, E) weight or (N, E) pos table does not fit the VMEM budget.

    # Prefer a tm that divides N so no row padding / output slice is needed.
    tm = None
    for cand in range(max_tm, 15, -16):
        if N % cand == 0:
            tm = cand
            break
    if tm is None:
        tm = max_tm
    n_pos = _round_up(N, tm)
    return tm, n_pos


def patch_embed(x, weight, bias, pos_embed, patch_size):
    """x: (B, C, D, H, W); weight: (E, C, pd, ph, pw); bias: (E,);
    pos_embed: (1, N, E).  Returns (B, N, E) matching
    Conv3d(k=p, stride=p) -> flatten(2) -> transpose(-1, -2) -> + pos_embed."""
    B, C, D, H, W = x.shape
    pd, ph, pw = patch_size
    Dp, Hp, Wp = D // pd, H // ph, W // pw
    N = Dp * Hp * Wp
    E = weight.shape[0]
    K = C * pd * ph * pw

    tm, Np = _choose_tiling(B, N, K, E)
    M = B * Np

    # --- glue: extract non-overlapping patches -> (M, K) bf16 ---
    # TODO(synk): fuse this reorder into the kernel (memory_space=pl.ANY +
    # manual DMA of contiguous W-row slabs) to avoid materializing the shuffled
    # copy of x; it is the largest remaining HBM cost for this mem-bound op.
    xb = x.astype(jnp.bfloat16)
    patches = xb.reshape(B, C, Dp, pd, Hp, ph, Wp, pw)
    patches = patches.transpose(0, 2, 4, 6, 1, 3, 5, 7)   # (B,Dp,Hp,Wp,C,pd,ph,pw)
    patches = patches.reshape(B, N, K)
    if Np != N:
        patches = jnp.pad(patches, ((0, 0), (0, Np - N), (0, 0)))
    patches = patches.reshape(M, K)

    # --- glue: flatten conv weight to (K, E) bf16 (VMEM-resident) ---
    w2d = weight.reshape(E, K).T.astype(jnp.bfloat16)

    # --- glue: fold bias into pos_embed, bf16, pad rows if needed ---
    pos2d = (pos_embed.reshape(N, E).astype(jnp.float32)
             + bias.reshape(1, E).astype(jnp.float32)).astype(jnp.bfloat16)
    if Np != N:
        pos2d = jnp.pad(pos2d, ((0, Np - N), (0, 0)))

    kernel = functools.partial(_patch_embed_kernel, tm=tm, n_pos=Np)

    out = pl.pallas_call(
        kernel,
        out_shape=jax.ShapeDtypeStruct((M, E), x.dtype),
        grid_spec=pltpu.PrefetchScalarGridSpec(
            num_scalar_prefetch=0,
            grid=(M // tm,),
            in_specs=[
                pl.BlockSpec((tm, K), lambda m: (m, 0)),   # patch rows, streamed
                pl.BlockSpec((K, E), lambda m: (0, 0)),    # weight, resident
                pl.BlockSpec((Np, E), lambda m: (0, 0)),   # pos (+bias), resident
            ],
            out_specs=pl.BlockSpec((tm, E), lambda m: (m, 0)),
        ),
        compiler_params=pltpu.CompilerParams(
            dimension_semantics=("parallel",),
            vmem_limit_bytes=32 * 1024 * 1024,
        ),
    )(patches, w2d, pos2d)

    out = out.reshape(B, Np, E)
    if Np != N:
        out = out[:, :N, :]
    return out


def _reference(x, weight, bias, pos_embed, patch_size):
    """Pure-JAX f32 reference matching PyTorch Conv3d(k=p, stride=p) + pos_embed."""
    y = jax.lax.conv_general_dilated(
        x, weight,
        window_strides=patch_size,
        padding="VALID",
        dimension_numbers=("NCDHW", "OIDHW", "NCDHW"),
    )                                                        # (B, E, D', H', W')
    B, E = y.shape[0], y.shape[1]
    y = y.reshape(B, E, -1).transpose(0, 2, 1)               # (B, N, E)
    y = y + bias.reshape(1, 1, E)
    return y + pos_embed


if __name__ == "__main__":
    # Small shapes consistent with the module:
    #   in_channels=4, img_size=(8,8,8), patch_size=(2,2,2), embed_dim=32
    B, C = 2, 4
    img_size = (8, 8, 8)
    patch_size = (2, 2, 2)
    E = 32
    N = int(np.prod([i // p for i, p in zip(img_size, patch_size)]))   # 64
    K = C * int(np.prod(patch_size))                                   # 32

    key = jax.random.PRNGKey(0)
    kx, kw, kb, kp = jax.random.split(key, 4)

    x = jax.random.normal(kx, (B, C) + img_size, dtype=jnp.float32)
    weight = jax.random.normal(kw, (E, C) + patch_size, dtype=jnp.float32) * 0.02
    bias = jax.random.normal(kb, (E,), dtype=jnp.float32) * 0.02
    pos_embed = jax.random.normal(kp, (1, N, E), dtype=jnp.float32) * 0.02
    # NOTE: the PyTorch module initializes pos_embed to zeros; random values
    # are used here so the pos-embed add in the kernel is actually exercised.

    out = patch_embed(x, weight, bias, pos_embed, patch_size)
    out = jax.block_until_ready(out)

    ref = _reference(x, weight, bias, pos_embed, patch_size)
    # bf16 matmul inputs / bf16 pos table with f32 accumulation -> relaxed
    # tolerance vs the f32 reference.
    np.testing.assert_allclose(np.asarray(out), np.asarray(ref), rtol=2e-2, atol=2e-2)

    print("KERNEL_OK")
</pallas_src>

<mosaic_0001>
module attributes {stable_mosaic.version = 11 : i64} {
  func.func @_patch_embed_kernel(%arg0: i32, %arg1: memref<16x32xbf16, #tpu.memory_space<vmem>>, %arg2: memref<32x32xbf16, #tpu.memory_space<vmem>>, %arg3: memref<64x32xbf16, #tpu.memory_space<vmem>>, %arg4: memref<16x32xf32, #tpu.memory_space<vmem>>) attributes {dimension_semantics = [#tpu.dimension_semantics<parallel>], iteration_bounds = array<i64: 8>, scalar_prefetch = 0 : i64, scratch_operands = 0 : i64, tpu.core_type = #tpu.core_type<tc>, window_params = [{transform_indices = @transform_0, window_bounds = array<i64: 16, 32>}, {pipeline_mode = #tpu.pipeline_mode<synchronous>, transform_indices = @transform_1, window_bounds = array<i64: 32, 32>}, {pipeline_mode = #tpu.pipeline_mode<synchronous>, transform_indices = @transform_2, window_bounds = array<i64: 64, 32>}, {transform_indices = @transform_3, window_bounds = array<i64: 16, 32>}]} {
    %c16_i32 = arith.constant 16 : i32
    %0 = arith.muli %arg0, %c16_i32 : i32
    %c64_i32 = arith.constant 64 : i32
    %c0_i32 = arith.constant 0 : i32
    %1 = arith.cmpi eq, %c64_i32, %c0_i32 : i32
    %c1_i32 = arith.constant 1 : i32
    %2 = arith.select %1, %c1_i32, %c64_i32 : i32
    %3 = arith.remsi %0, %2 : i32
    %c0_i32_0 = arith.constant 0 : i32
    %4 = arith.cmpi ne, %3, %c0_i32_0 : i32
    %c0_i32_1 = arith.constant 0 : i32
    %5 = arith.cmpi slt, %3, %c0_i32_1 : i32
    %c0_i32_2 = arith.constant 0 : i32
    %6 = arith.cmpi slt, %2, %c0_i32_2 : i32
    %7 = arith.xori %5, %6 : i1
    %8 = arith.andi %7, %4 : i1
    %9 = arith.addi %3, %2 : i32
    %10 = arith.select %8, %9, %3 : i32
    %11 = tpu.assume_multiple %10, 16 : i32
    %c0 = arith.constant 0 : index
    %c0_3 = arith.constant 0 : index
    %12 = vector.load %arg1[%c0, %c0_3] : memref<16x32xbf16, #tpu.memory_space<vmem>>, vector<16x32xbf16>
    %c0_4 = arith.constant 0 : index
    %c0_5 = arith.constant 0 : index
    %13 = vector.load %arg2[%c0_4, %c0_5] : memref<32x32xbf16, #tpu.memory_space<vmem>>, vector<32x32xbf16>
    %cst = arith.constant dense<0.000000e+00> : vector<16x32xf32>
    %14 = tpu.matmul %12, %13, %cst {dimension_numbers = #tpu.dot_dimension_numbers<[1], [0], [0], [1], [0, 0, 1, 1], [], []>} : vector<16x32xbf16>, vector<32x32xbf16>, vector<16x32xf32> -> vector<16x32xf32>
    %15 = arith.index_cast %11 : i32 to index
    %c0_6 = arith.constant 0 : index
    %16 = vector.load %arg3[%15, %c0_6] : memref<64x32xbf16, #tpu.memory_space<vmem>>, vector<16x32xbf16>
    %17 = arith.extf %16 : vector<16x32xbf16> to vector<16x32xf32>
    %18 = arith.addf %14, %17 : vector<16x32xf32>
    %c0_7 = arith.constant 0 : index
    %c0_8 = arith.constant 0 : index
    %19 = vector.load %arg4[%c0_7, %c0_8] : memref<16x32xf32, #tpu.memory_space<vmem>>, vector<16x32xf32>
    tpu.vector_store %arg4[%c0_7, %c0_8], %18 {strides = array<i32>} : memref<16x32xf32, #tpu.memory_space<vmem>>, vector<16x32xf32>,
    return
  }
  func.func @transform_0(%arg0: i32) -> (i32, i32) {
    %c0_i32 = arith.constant 0 : i32
    %c0_i32_0 = arith.constant 0 : i32
    return %arg0, %c0_i32 : i32, i32
  }
  func.func @transform_1(%arg0: i32) -> (i32, i32) {
    %c0_i32 = arith.constant 0 : i32
    %c0_i32_0 = arith.constant 0 : i32
    %c0_i32_1 = arith.constant 0 : i32
    return %c0_i32, %c0_i32_0 : i32, i32
  }
  func.func @transform_2(%arg0: i32) -> (i32, i32) {
    %c0_i32 = arith.constant 0 : i32
    %c0_i32_0 = arith.constant 0 : i32
    %c0_i32_1 = arith.constant 0 : i32
    return %c0_i32, %c0_i32_0 : i32, i32
  }
  func.func @transform_3(%arg0: i32) -> (i32, i32) {
    %c0_i32 = arith.constant 0 : i32
    %c0_i32_0 = arith.constant 0 : i32
    return %arg0, %c0_i32 : i32, i32
  }
}

</mosaic_0001>

<bundles_post_ra>
// kernel: tpu_custom_call.1
= control target key start
LH: loop header
LB: loop body
LE: loop exit
PB: predicated region body
PF: predicated region fallthrough
CT: control target
= control target key end

     0   :  { %s402_s12 = smov 0   ;;  %s431_s0 = inlined_call_operand.vmem [shape: bf16[128,32], index: 0, kind: input, shape index: {}]   ;;  %s432_s1 = inlined_call_operand.vmem [shape: bf16[32,32], index: 1, kind: input, shape index: {}]   ;;  %s433_s2 = inlined_call_operand.vmem [shape: bf16[64,32], index: 2, kind: input, shape index: {}]   ;;  %s434_s3 = inlined_call_operand.vmem [shape: f32[128,32], index: 3, kind: output, shape index: {}]  }
   0x1 LB: > { %s324_s13 = sadd.s32 4294967295, %s378_s12   ;;  %p328_p0 = scmp.ge.s32.totalorder %s378_s12, 1  ;;  %s378_s12 = sphi %s402_s12, %s13_s12  }
   0x2   : > { %p138_p1 = scmp.lt.s32.totalorder %s378_s12, 9 }
   0x4   : > { %p139_p2 = pnand %p328_p0, %p138_p1 }
   0x5   : > { %s329_s18 = sshll.u32 (!%p139_p2), %s324_s13, 1  ;;  %s333_s23 = sshll.u32 (!%p139_p2), %s324_s13, 4 }
   0x6   : > { %142 = sbr.rel (%p139_p2) target bundleno = 220 (0xdc), region = 32  ;;  %p163_p3 = scmp.lt.s32.totalorder (!%p139_p2), %s329_s18, 15 }
   0x7   : > { %s177_s24 = ssub.s32 (!%p139_p2), 0, %s333_s23  ;;  %p176_p4 = scmp.lt.s32.totalorder (!%p139_p2), %s333_s23, 0 }
   0x8   : > { %s334_s25 = smin.u32 (!%p139_p2), %s333_s23, %s177_s24 }
   0x9   : > { %s179_s26 = sand.u32 (!%p139_p2), 63, %s334_s25  }
   0xa   : > { %s180_s27 = ssub.s32 (!%p139_p2), 0, %s179_s26 }
   0xb   : > { %v369_v0 = vld [vmem:[%s432_s1 + $0x8] sm:$0xff]   ;;  %v380_v1 = vmov 0.0   ;;  %v370_v2 = vld [vmem:[%s432_s1] sm:$0xff]   ;;  %vm381_vm0 = vmmov 0   ;;  %s436_s18 = smov (!%p163_p3, %s329_s18), 15  ;;  %vm219_vm1 = vcmask 261120   ;;  %s438_s27 = smov (!%p176_p4, %s180_s27), %s179_s26 }
   0xc   : > { %351 = vmatprep.subr.bf16.mxu0 %v380_v1  ;;  %355 = vmatprep.mubr.msk.bf16.mxu0 %vm381_vm0, %v380_v1  ;;  %s330_s19 = sshll.u32 %s436_s18, 2  ;;  %p336_p5 = scmp.lt.s32.totalorder %s438_s27, 0 }
   0xd   : > { %352 = vmatpush3.bf16.msra.mxu0 %v369_v0  ;;  %s166_s22 = scalar_lea.vmem %s431_s0, %s330_s19  ;;  %s186_s28 = sadd.s32 64, %s438_s27 }
   0xe   : > { %353 = vmatprep.subr.bf16.mxu0 %v380_v1  ;;  %v371_v3 = vld [vmem:[%s166_s22] sm:$0xff]   ;;  %s440_s28 = smov (!%p336_p5, %s186_s28), %s438_s27  ;;  %s332_s7 = sshll.u32 %s436_s18, 3 }
   0xf   : > { %s194_s29 = sshra.s32 %s440_s28, 3  ;;  %s172_s10 = scalar_lea.vmem %s434_s3, %s332_s7 }
  0x10   : > { %s337_s30 = sshll.u32 %s194_s29, 2 }
  0x11   : > { %354 = vmatpush3.bf16.msra.mxu0 %v370_v2  ;;  %s197_s6 = scalar_lea.vmem %s433_s2, %s337_s30 }
  0x12   : > { %v345_v4 = vld [vmem:[%s197_s6] sm:$0xff]  }
  0x13   : > { %v346_v5 = vunpack.c.l.bf16 %v345_v4  ;;  %v347_v8 = vunpack.c.h.bf16 %v345_v4 }
  0x14   : > { %356 = vmatmul.mubr.msk.bf16.vlgmr.msra.gmra.mxu0 %vm219_vm1, %v371_v3 }
  0xd4   : > { %v257_v6 = vpop.f32.mrf.mxu0 }
  0xd5   : > { %v258_v7 = vadd.f32 %v346_v5, %v257_v6 }
  0xd6   : > { %v357_v9 = vpop.f32.mrf.mxu0 }
  0xd7   : > { %264 = vst.msk [vmem:[%s172_s10] sm:$0xff] %vm219_vm1, %v258_v7 }
  0xd8   : > { %v260_v10 = vpop.f32.mrf.mxu0 }
  0xd9   : > { %v261_v11 = vadd.f32 %v347_v8, %v260_v10 }
  0xda   : > { %v358_v12 = vpop.f32.mrf.mxu0 }
  0xdb   : > { %265 = vst.msk [vmem:[%s172_s10 + $0x8] sm:$0xff] %vm219_vm1, %v261_v11 }
  0xdc PF: > { %s13_s12 = sadd.s32 1, %s378_s12  }
  0xdd   : > { %p10_p6 = scmp.ge.s32.totalorder %s13_s12, 10  }
  0xdf   :  { %12 = sbr.rel (!%p10_p6) target bundleno = 1 (0x1), region = 63 }

</bundles_post_ra>
